<compile_context>
chip_gen: v5e
topology: v5e:2x2
jax: 0.10.0
libtpu: 0.0.40
codegen_flags: <defaults>
</compile_context>

<pallas_src>
import jax
import jax.numpy as jnp
from jax.experimental import pallas as pl
from jax.experimental.pallas import tpu as pltpu


def _make_flatten_dma_kernel(row_splits):
    """Kernel copying a (rows, cols) HBM array to HBM in contiguous row chunks."""
    n_chunks = len(row_splits) - 1

    def kernel(x_hbm, o_hbm, sems):
        # Start every chunk first so the DMA engines stream concurrently,
        # then wait on all of them.
        for i in range(n_chunks):
            lo = row_splits[i]
            sz = row_splits[i + 1] - lo
            pltpu.make_async_copy(
                x_hbm.at[pl.ds(lo, sz)],
                o_hbm.at[pl.ds(lo, sz)],
                sems.at[i],
            ).start()
        for i in range(n_chunks):
            lo = row_splits[i]
            sz = row_splits[i + 1] - lo
            pltpu.make_async_copy(
                x_hbm.at[pl.ds(lo, sz)],
                o_hbm.at[pl.ds(lo, sz)],
                sems.at[i],
            ).wait()

    return kernel


def _flatten_pallas(x2):
    """HBM->HBM streaming copy of an already-flattened (B, feat) array."""
    b, feat = x2.shape
    itemsize = jnp.dtype(x2.dtype).itemsize
    nbytes = b * feat * itemsize

    # Split rows into up to 4 contiguous chunks so multiple DMA engines can
    # run in parallel; degenerate gracefully to one whole-array DMA if B < 4.
    n_chunks = max(1, min(4, b))
    base, rem = divmod(b, n_chunks)
    row_splits = [0]
    for i in range(n_chunks):
        row_splits.append(row_splits[-1] + base + (1 if i < rem else 0))

    kernel = _make_flatten_dma_kernel(row_splits)

    cost = pl.CostEstimate(
        flops=0,
        transcendentals=0,
        bytes_accessed=2 * nbytes,
    )

    return pl.pallas_call(
        kernel,
        out_shape=jax.ShapeDtypeStruct((b, feat), x2.dtype),
        in_specs=[pl.BlockSpec(memory_space=pl.ANY)],
        out_specs=pl.BlockSpec(memory_space=pl.ANY),
        scratch_shapes=[pltpu.SemaphoreType.DMA((n_chunks,))],
        cost_estimate=cost,
    )(x2)


def flatten(x, *, min_kernel_bytes=2 * 1024 * 1024):
    """Pallas equivalent of torch Flatten: (B, ...) -> (B, prod(...))."""
    b = x.shape[0]
    feat = 1
    for d in x.shape[1:]:
        feat *= d

    # Free metadata reshape (row-major over (C, H, W) == torch .view on a
    # contiguous NCHW tensor).
    x2 = x.reshape(b, feat)

    itemsize = jnp.dtype(x.dtype).itemsize
    if b * feat * itemsize < min_kernel_bytes:
        # Small-size fast path: Flatten is a pure metadata op; the pallas_call
        # launch overhead would dominate, so return the reshape directly.
        return x2

    return _flatten_pallas(x2)


if __name__ == "__main__":
    key = jax.random.PRNGKey(0)
    # Small NCHW input consistent with a conv-net feature map: B=2, C=4, 16x16
    x = jax.random.normal(key, (2, 4, 16, 16), dtype=jnp.float32)

    ref = x.reshape(x.shape[0], -1)

    # Default path: below threshold -> pure metadata reshape (zero copies).
    y_fast = flatten(x)
    jax.block_until_ready(y_fast)
    assert y_fast.shape == (2, 4 * 16 * 16), y_fast.shape
    assert jnp.array_equal(y_fast, ref), "fast path mismatch vs reference"

    # Force the Pallas HBM->HBM DMA kernel path once to exercise the kernel.
    y_kern = flatten(x, min_kernel_bytes=0)
    jax.block_until_ready(y_kern)
    assert y_kern.shape == (2, 4 * 16 * 16), y_kern.shape
    assert jnp.array_equal(y_kern, ref), "kernel path mismatch vs reference"

    print("KERNEL_OK")
</pallas_src>

<mosaic_0001>
module attributes {stable_mosaic.version = 11 : i64} {
  func.func @kernel(%arg0: memref<2x1024xf32, #tpu.memory_space<any>>, %arg1: memref<2x1024xf32, #tpu.memory_space<any>>, %arg2: memref<2x!tpu.dma_semaphore, #tpu.memory_space<semaphore_mem>>) attributes {dimension_semantics = [], scalar_prefetch = 0 : i64, scratch_operands = 1 : i64, tpu.core_type = #tpu.core_type<tc>} {
    %c0_i32 = arith.constant 0 : i32
    %c0_i32_0 = arith.constant 0 : i32
    %c0_i32_1 = arith.constant 0 : i32
    %0 = tpu.memref_slice %arg0[%c0_i32_0, %c0_i32_1] : memref<2x1024xf32, #tpu.memory_space<any>> -> memref<1x1024xf32, #tpu.memory_space<any>>
    %c0_i32_2 = arith.constant 0 : i32
    %c0_i32_3 = arith.constant 0 : i32
    %1 = tpu.memref_slice %arg1[%c0_i32_2, %c0_i32_3] : memref<2x1024xf32, #tpu.memory_space<any>> -> memref<1x1024xf32, #tpu.memory_space<any>>
    %2 = tpu.memref_slice %arg2[%c0_i32] : memref<2x!tpu.dma_semaphore, #tpu.memory_space<semaphore_mem>> -> memref<1x!tpu.dma_semaphore, #tpu.memory_space<semaphore_mem>>
    %3 = tpu.memref_squeeze %2 : memref<1x!tpu.dma_semaphore, #tpu.memory_space<semaphore_mem>> -> memref<!tpu.dma_semaphore, #tpu.memory_space<semaphore_mem>>
    tpu.enqueue_dma source(%0 : memref<1x1024xf32, #tpu.memory_space<any>>) target(%1 : memref<1x1024xf32, #tpu.memory_space<any>>) target_semaphore(%3 : memref<!tpu.dma_semaphore, #tpu.memory_space<semaphore_mem>>)
    %c1_i32 = arith.constant 1 : i32
    %c1_i32_4 = arith.constant 1 : i32
    %c0_i32_5 = arith.constant 0 : i32
    %4 = tpu.memref_slice %arg0[%c1_i32_4, %c0_i32_5] : memref<2x1024xf32, #tpu.memory_space<any>> -> memref<1x1024xf32, #tpu.memory_space<any>>
    %c1_i32_6 = arith.constant 1 : i32
    %c0_i32_7 = arith.constant 0 : i32
    %5 = tpu.memref_slice %arg1[%c1_i32_6, %c0_i32_7] : memref<2x1024xf32, #tpu.memory_space<any>> -> memref<1x1024xf32, #tpu.memory_space<any>>
    %6 = tpu.memref_slice %arg2[%c1_i32] : memref<2x!tpu.dma_semaphore, #tpu.memory_space<semaphore_mem>> -> memref<1x!tpu.dma_semaphore, #tpu.memory_space<semaphore_mem>>
    %7 = tpu.memref_squeeze %6 : memref<1x!tpu.dma_semaphore, #tpu.memory_space<semaphore_mem>> -> memref<!tpu.dma_semaphore, #tpu.memory_space<semaphore_mem>>
    tpu.enqueue_dma source(%4 : memref<1x1024xf32, #tpu.memory_space<any>>) target(%5 : memref<1x1024xf32, #tpu.memory_space<any>>) target_semaphore(%7 : memref<!tpu.dma_semaphore, #tpu.memory_space<semaphore_mem>>)
    %c0_i32_8 = arith.constant 0 : i32
    %c0_i32_9 = arith.constant 0 : i32
    %c0_i32_10 = arith.constant 0 : i32
    %8 = tpu.memref_slice %arg0[%c0_i32_9, %c0_i32_10] : memref<2x1024xf32, #tpu.memory_space<any>> -> memref<1x1024xf32, #tpu.memory_space<any>>
    %c0_i32_11 = arith.constant 0 : i32
    %c0_i32_12 = arith.constant 0 : i32
    %9 = tpu.memref_slice %arg1[%c0_i32_11, %c0_i32_12] : memref<2x1024xf32, #tpu.memory_space<any>> -> memref<1x1024xf32, #tpu.memory_space<any>>
    %10 = tpu.memref_slice %arg2[%c0_i32_8] : memref<2x!tpu.dma_semaphore, #tpu.memory_space<semaphore_mem>> -> memref<1x!tpu.dma_semaphore, #tpu.memory_space<semaphore_mem>>
    %11 = tpu.memref_squeeze %10 : memref<1x!tpu.dma_semaphore, #tpu.memory_space<semaphore_mem>> -> memref<!tpu.dma_semaphore, #tpu.memory_space<semaphore_mem>>
    tpu.wait_dma2 semaphore(%11 : memref<!tpu.dma_semaphore, #tpu.memory_space<semaphore_mem>>) src(%8 : memref<1x1024xf32, #tpu.memory_space<any>>) dst(%9 : memref<1x1024xf32, #tpu.memory_space<any>>)
    %c1_i32_13 = arith.constant 1 : i32
    %c1_i32_14 = arith.constant 1 : i32
    %c0_i32_15 = arith.constant 0 : i32
    %12 = tpu.memref_slice %arg0[%c1_i32_14, %c0_i32_15] : memref<2x1024xf32, #tpu.memory_space<any>> -> memref<1x1024xf32, #tpu.memory_space<any>>
    %c1_i32_16 = arith.constant 1 : i32
    %c0_i32_17 = arith.constant 0 : i32
    %13 = tpu.memref_slice %arg1[%c1_i32_16, %c0_i32_17] : memref<2x1024xf32, #tpu.memory_space<any>> -> memref<1x1024xf32, #tpu.memory_space<any>>
    %14 = tpu.memref_slice %arg2[%c1_i32_13] : memref<2x!tpu.dma_semaphore, #tpu.memory_space<semaphore_mem>> -> memref<1x!tpu.dma_semaphore, #tpu.memory_space<semaphore_mem>>
    %15 = tpu.memref_squeeze %14 : memref<1x!tpu.dma_semaphore, #tpu.memory_space<semaphore_mem>> -> memref<!tpu.dma_semaphore, #tpu.memory_space<semaphore_mem>>
    tpu.wait_dma2 semaphore(%15 : memref<!tpu.dma_semaphore, #tpu.memory_space<semaphore_mem>>) src(%12 : memref<1x1024xf32, #tpu.memory_space<any>>) dst(%13 : memref<1x1024xf32, #tpu.memory_space<any>>)
    return
  }
}

</mosaic_0001>

<bundles_post_ra>
// kernel: tpu_custom_call.1
= control target key start
LH: loop header
LB: loop body
LE: loop exit
PB: predicated region body
PF: predicated region fallthrough
CT: control target
= control target key end

     0   :  { %s76_s12 = smov 32   ;;  %s77_s13 = smov 1   ;;  %s105_s0 = inlined_call_operand.hbm [shape: f32[2,1024], index: 0, kind: input, shape index: {}]   ;;  %s106_s1 = inlined_call_operand.hbm [shape: f32[2,1024], index: 1, kind: output, shape index: {}]  }
   0x1   :  { %s10_s8 = sshll.u32 %s105_s0, 4  ;;  %s12_s11 = sshll.u32 %s106_s1, 4  ;;  %s11_s8 = int_to_ptr.hbm [resolvable:$true] %s10_s8  ;;  %s13_s11 = int_to_ptr.hbm [resolvable:$true] %s12_s11 }
   0x2   :  { %17 = sst [smem:[#allocation4]] %s76_s12  ;;  %s78_s14 = smov [#allocation2]  }
   0x3   :  { %19 = sst [smem:[#allocation4 + $0x1]] %s76_s12  ;;  %s79_s15 = smov [#allocation3]  }
   0x4   :  { %21 = sst [smem:[#allocation4 + $0x2]] %s77_s13  ;;  %s80_s16 = smov 0  }
   0x5   :  { %23 = dma.general %s11_s8, 128, %s13_s11, %s78_s14, %s79_s15, [#allocation4], %s80_s16, 0  }
   0x6   :  { %38 = sst [smem:[#allocation6]] %s76_s12  ;;  %s24_s19 = scalar_lea.hbm %s105_s0, 1 }
   0x7   :  { %40 = sst [smem:[#allocation6 + $0x1]] %s76_s12  ;;  %s25_s22 = scalar_lea.hbm %s106_s1, 1 }
   0x8   :  { %42 = sst [smem:[#allocation6 + $0x2]] %s77_s13  ;;  %s31_s23 = sshll.u32 %s24_s19, 4  ;;  %s32_s23 = int_to_ptr.hbm [resolvable:$true] %s31_s23 }
   0x9   :  { %s33_s24 = sshll.u32 %s25_s22, 4  ;;  %s81_s25 = smov [#allocation2 + $0x1]   ;;  %s34_s24 = int_to_ptr.hbm [resolvable:$true] %s33_s24 }
   0xa   :  { %s82_s26 = smov [#allocation5]  }
   0xb   :  { %44 = dma.general %s32_s23, 128, %s34_s24, %s81_s25, %s82_s26, [#allocation6], %s80_s16, 0  }
   0xc   :  { %72 = dma.done.wait [#allocation2], 128 }
   0xd   :  { %73 = vsyncadd [#allocation2], 4294967168 }
   0xe   :  { %74 = dma.done.wait [#allocation2 + $0x1], 128 }
   0xf   :  { %75 = vsyncadd [#allocation2 + $0x1], 4294967168 }
  0x10   :  { %50 = vsyncmov [#allocation2] }
  0x13   :  { %s51_s27 = vpop.sfrf %50 }
  0x14   :  { %p63_p0 = scmp.ne.s32.totalorder %s51_s27, 0 }
  0x16   :  { %55 = shalt.err (%p63_p0)  }
  0x17   :  { %57 = vsyncmov [#allocation2 + $0x1] }
  0x1a   :  { %s58_s0 = vpop.sfrf %57 }
  0x1b   :  { %p64_p1 = scmp.ne.s32.totalorder %s58_s0, 0 }
  0x1d   :  { %62 = shalt.err (%p64_p1)  }

</bundles_post_ra>
